<compile_context>
chip_gen: v6e
topology: v6e:2x2x1
jax: 0.10.0
libtpu: 0.0.40
codegen_flags: <defaults>
</compile_context>

<pallas_src>
import functools
import math

import jax
import jax.numpy as jnp
from jax.experimental import pallas as pl
from jax.experimental.pallas import tpu as pltpu


def _round_up(x, m):
    return (x + m - 1) // m * m


def _pos_enc_kernel(packed_ref, expand_ref, cmap_ref, table_ref, out_ref, *, max_rel):
    """One row-group tile.

    packed_ref : (TMG, G)    int32   (offset << 1) | mask, G rows per group
    expand_ref : (G, G*NC)   float32 expand[g, j] = 1.0 if j // NC == g else 0
    cmap_ref   : (1, G*NC)   float32 cmap[0, j] = j % NC
    table_ref  : (G*NC, G*E) float32 block-diagonal, bias-folded lookup table
    out_ref    : (TMG, G*E)  lane-dense packed embeddings
    """
    packed = packed_ref[...]
    m = packed & 1                      # binary mask (low bit)
    off = packed >> 1                   # arithmetic shift recovers signed offset

    # d in [0, 2*max_rel + 1], int32, per (group-row, in-group position).
    d = jnp.clip(off + max_rel, 0, 2 * max_rel) * m + (1 - m) * (2 * max_rel + 1)
    d_f = d.astype(jnp.float32)         # small exact integers

    # Lane-expand d across each group's NC lanes with a tiny MXU matmul:
    # d_exp[r, j] = d[r, j // NC]   (exact: single 1.0 term per output element)
    d_exp = jnp.dot(d_f, expand_ref[...], preferred_element_type=jnp.float32)

    # Positioned one-hot over the block-diagonal K axis.
    # Compare with a 0.5 tolerance: values are exact small integers, the
    # tolerance just makes this immune to any MXU rounding-mode differences.
    onehot = (jnp.abs(d_exp - cmap_ref[...]) < 0.5).astype(jnp.float32)

    # Embedding lookup + row packing in ONE MXU matmul (bias folded in table).
    out_ref[...] = jnp.dot(
        onehot, table_ref[...], preferred_element_type=jnp.float32
    ).astype(out_ref.dtype)


def positional_encodings_pallas(offset, mask, weight, bias, *,
                                max_relative_feature=32, tm=4096,
                                out_dtype=jnp.float32):
    """offset, mask: integer tensors of identical shape (...,), mask binary {0,1}.
    weight: (num_embeddings, 2*max_rel + 2) — PyTorch nn.Linear layout.
    bias:   (num_embeddings,).
    Returns E with shape offset.shape + (num_embeddings,) in out_dtype."""
    num_emb, nc = weight.shape
    assert nc == 2 * max_relative_feature + 2
    assert bias.shape == (num_emb,)
    assert offset.shape == mask.shape

    # Group size G: fold G rows into lanes so the packed output width G*num_emb
    # is a multiple of 128 (lane-dense stores).  Cap G so the block-diagonal
    # table stays small; any power-of-two G is correct.
    G = 128 // math.gcd(num_emb, 128)
    while G > 1 and (G * nc) * (G * num_emb) * 4 > (2 << 20):
        G //= 2

    # Bias-folded base table (exact: each one-hot row sums to exactly 1),
    # then block-diagonal replication so one matmul emits G packed rows.
    base = (weight.T + bias[None, :]).astype(jnp.float32)            # (NC, E)
    table = jnp.kron(jnp.eye(G, dtype=jnp.float32), base)            # (G*NC, G*E)

    j = jnp.arange(G * nc, dtype=jnp.int32)
    gidx = jnp.arange(G, dtype=jnp.int32)
    expand = (j[None, :] // nc == gidx[:, None]).astype(jnp.float32)  # (G, G*NC)
    cmap = (j % nc).astype(jnp.float32)[None, :]                      # (1, G*NC)

    shape = offset.shape
    M = 1
    for s in shape:
        M *= int(s)
    M = max(M, 1)

    # Row tiling: big tiles amortize the ~0.35 us per-grid-step overhead.
    row_align = G * 8                                  # keeps tm_g a sublane multiple
    tm_req = _round_up(max(int(tm), row_align), row_align)
    m_needed = _round_up(M, row_align)
    tm_eff = min(tm_req, m_needed)
    m_pad = _round_up(M, tm_eff)

    # Pack offset & mask into one int32 stream; pad rows map to the
    # "no-contact" class and are sliced off after the call.
    off_flat = offset.reshape(-1).astype(jnp.int32)
    msk_flat = mask.reshape(-1).astype(jnp.int32)
    packed = (off_flat << 1) | msk_flat
    if m_pad != M:
        packed = jnp.pad(packed, (0, m_pad - M))
    packed = packed.reshape(m_pad // G, G)             # group-of-G layout

    tm_g = tm_eff // G
    grid = (m_pad // tm_eff,)

    out2d = pl.pallas_call(
        functools.partial(_pos_enc_kernel, max_rel=int(max_relative_feature)),
        out_shape=jax.ShapeDtypeStruct((m_pad // G, G * num_emb), out_dtype),
        grid_spec=pltpu.PrefetchScalarGridSpec(
            num_scalar_prefetch=0,
            grid=grid,
            in_specs=[
                pl.BlockSpec((tm_g, G), lambda i: (i, 0)),            # packed rows
                pl.BlockSpec((G, G * nc), lambda i: (0, 0)),          # resident expand
                pl.BlockSpec((1, G * nc), lambda i: (0, 0)),          # resident cmap
                pl.BlockSpec((G * nc, G * num_emb), lambda i: (0, 0)),  # resident table
            ],
            out_specs=pl.BlockSpec((tm_g, G * num_emb), lambda i: (i, 0)),
        ),
        compiler_params=pltpu.CompilerParams(
            dimension_semantics=("parallel",)),
    )(packed, expand, cmap, table)

    # Un-fold groups: pure row-major reshape (same HBM bytes), then drop padding.
    out = out2d.reshape(m_pad, num_emb)[:M].reshape(shape + (num_emb,))
    return out


def positional_encodings_ref(offset, mask, weight, bias, *, max_relative_feature=32):
    """Pure-JAX reference mirroring the PyTorch forward exactly."""
    nc = 2 * max_relative_feature + 2
    offset = offset.astype(jnp.int32)
    mask = mask.astype(jnp.int32)
    d = (jnp.clip(offset + max_relative_feature, 0, 2 * max_relative_feature) * mask
         + (1 - mask) * (2 * max_relative_feature + 1))
    d_onehot = jax.nn.one_hot(d, nc, dtype=jnp.float32)
    return d_onehot @ weight.T + bias


if __name__ == "__main__":
    num_embeddings = 16
    max_relative_feature = 32
    B, L, K = 2, 8, 16          # offset/mask shape (B, L, K); M = 256 rows

    key = jax.random.PRNGKey(0)
    k_w, k_b, k_off, k_msk = jax.random.split(key, 4)

    nc = 2 * max_relative_feature + 2
    weight = 0.1 * jax.random.normal(k_w, (num_embeddings, nc), jnp.float32)
    bias = 0.1 * jax.random.normal(k_b, (num_embeddings,), jnp.float32)

    # Offsets outside [-max_rel, max_rel] to exercise the clip; binary mask.
    offset = jax.random.randint(k_off, (B, L, K), -40, 41, dtype=jnp.int32)
    mask = (jax.random.uniform(k_msk, (B, L, K)) > 0.2).astype(jnp.int32)

    # tm=128 keeps the demo grid at 2 steps (exercises pipelining / both v7x
    # cores); production callers leave the default tm=4096 (or larger).
    out = positional_encodings_pallas(
        offset, mask, weight, bias,
        max_relative_feature=max_relative_feature, tm=128)
    out = jax.block_until_ready(out)

    ref = positional_encodings_ref(
        offset, mask, weight, bias, max_relative_feature=max_relative_feature)

    assert out.shape == (B, L, K, num_embeddings)
    assert jnp.allclose(out, ref, atol=1e-5, rtol=1e-5), "mismatch vs JAX reference"

    print("KERNEL_OK")
</pallas_src>

<mosaic_0001>
module attributes {stable_mosaic.version = 11 : i64} {
  func.func @_pos_enc_kernel(%arg0: i32, %arg1: memref<16x8xi32, #tpu.memory_space<vmem>>, %arg2: memref<8x528xf32, #tpu.memory_space<vmem>>, %arg3: memref<1x528xf32, #tpu.memory_space<vmem>>, %arg4: memref<528x128xf32, #tpu.memory_space<vmem>>, %arg5: memref<16x128xf32, #tpu.memory_space<vmem>>) attributes {dimension_semantics = [#tpu.dimension_semantics<parallel>], iteration_bounds = array<i64: 2>, scalar_prefetch = 0 : i64, scratch_operands = 0 : i64, tpu.core_type = #tpu.core_type<tc>, window_params = [{transform_indices = @transform_0, window_bounds = array<i64: 16, 8>}, {pipeline_mode = #tpu.pipeline_mode<synchronous>, transform_indices = @transform_1, window_bounds = array<i64: 8, 528>}, {pipeline_mode = #tpu.pipeline_mode<synchronous>, transform_indices = @transform_2, window_bounds = array<i64: 1, 528>}, {pipeline_mode = #tpu.pipeline_mode<synchronous>, transform_indices = @transform_3, window_bounds = array<i64: 528, 128>}, {transform_indices = @transform_4, window_bounds = array<i64: 16, 128>}]} {
    %c0 = arith.constant 0 : index
    %c0_0 = arith.constant 0 : index
    %0 = vector.load %arg1[%c0, %c0_0] : memref<16x8xi32, #tpu.memory_space<vmem>>, vector<16x8xi32>
    %c1_i32 = arith.constant 1 : i32
    %1 = vector.broadcast %c1_i32 : i32 to vector<16x8xi32>
    %2 = arith.andi %0, %1 : vector<16x8xi32>
    %c1_i32_1 = arith.constant 1 : i32
    %3 = vector.broadcast %c1_i32_1 : i32 to vector<16x8xi32>
    %4 = arith.shrsi %0, %3 : vector<16x8xi32>
    %c32_i32 = arith.constant 32 : i32
    %5 = vector.broadcast %c32_i32 : i32 to vector<16x8xi32>
    %6 = arith.addi %4, %5 : vector<16x8xi32>
    %c0_i32 = arith.constant 0 : i32
    %c64_i32 = arith.constant 64 : i32
    %7 = vector.broadcast %c0_i32 : i32 to vector<16x8xi32>
    %8 = arith.maxsi %7, %6 : vector<16x8xi32>
    %9 = vector.broadcast %c64_i32 : i32 to vector<16x8xi32>
    %10 = arith.minsi %9, %8 : vector<16x8xi32>
    %11 = arith.muli %10, %2 : vector<16x8xi32>
    %c1_i32_2 = arith.constant 1 : i32
    %12 = vector.broadcast %c1_i32_2 : i32 to vector<16x8xi32>
    %13 = arith.subi %12, %2 : vector<16x8xi32>
    %c65_i32 = arith.constant 65 : i32
    %14 = vector.broadcast %c65_i32 : i32 to vector<16x8xi32>
    %15 = arith.muli %13, %14 : vector<16x8xi32>
    %16 = arith.addi %11, %15 : vector<16x8xi32>
    %17 = arith.sitofp %16 : vector<16x8xi32> to vector<16x8xf32>
    %c0_3 = arith.constant 0 : index
    %c0_4 = arith.constant 0 : index
    %18 = vector.load %arg2[%c0_3, %c0_4] : memref<8x528xf32, #tpu.memory_space<vmem>>, vector<8x528xf32>
    %cst = arith.constant dense<0.000000e+00> : vector<16x528xf32>
    %19 = tpu.matmul %17, %18, %cst {dimension_numbers = #tpu.dot_dimension_numbers<[1], [0], [0], [1], [0, 0, 1, 1], [], []>} : vector<16x8xf32>, vector<8x528xf32>, vector<16x528xf32> -> vector<16x528xf32>
    %c0_5 = arith.constant 0 : index
    %c0_6 = arith.constant 0 : index
    %20 = vector.load %arg3[%c0_5, %c0_6] : memref<1x528xf32, #tpu.memory_space<vmem>>, vector<1x528xf32>
    %21 = vector.broadcast %20 : vector<1x528xf32> to vector<16x528xf32>
    %22 = arith.subf %19, %21 : vector<16x528xf32>
    %23 = math.absf %22 : vector<16x528xf32>
    %cst_7 = arith.constant 5.000000e-01 : f32
    %24 = vector.broadcast %cst_7 : f32 to vector<16x528xf32>
    %25 = arith.cmpf olt, %23, %24 : vector<16x528xf32>
    %26 = arith.extui %25 : vector<16x528xi1> to vector<16x528xi32>
    %27 = arith.sitofp %26 : vector<16x528xi32> to vector<16x528xf32>
    %c0_8 = arith.constant 0 : index
    %c0_9 = arith.constant 0 : index
    %28 = vector.load %arg4[%c0_8, %c0_9] : memref<528x128xf32, #tpu.memory_space<vmem>>, vector<528x128xf32>
    %cst_10 = arith.constant dense<0.000000e+00> : vector<16x128xf32>
    %29 = tpu.matmul %27, %28, %cst_10 {dimension_numbers = #tpu.dot_dimension_numbers<[1], [0], [0], [1], [0, 0, 1, 1], [], []>} : vector<16x528xf32>, vector<528x128xf32>, vector<16x128xf32> -> vector<16x128xf32>
    %c0_11 = arith.constant 0 : index
    %c0_12 = arith.constant 0 : index
    %30 = vector.load %arg5[%c0_11, %c0_12] : memref<16x128xf32, #tpu.memory_space<vmem>>, vector<16x128xf32>
    tpu.vector_store %arg5[%c0_11, %c0_12], %29 {strides = array<i32>} : memref<16x128xf32, #tpu.memory_space<vmem>>, vector<16x128xf32>,
    return
  }
  func.func @transform_0(%arg0: i32) -> (i32, i32) {
    %c0_i32 = arith.constant 0 : i32
    %c0_i32_0 = arith.constant 0 : i32
    return %arg0, %c0_i32 : i32, i32
  }
  func.func @transform_1(%arg0: i32) -> (i32, i32) {
    %c0_i32 = arith.constant 0 : i32
    %c0_i32_0 = arith.constant 0 : i32
    %c0_i32_1 = arith.constant 0 : i32
    return %c0_i32, %c0_i32_0 : i32, i32
  }
  func.func @transform_2(%arg0: i32) -> (i32, i32) {
    %c0_i32 = arith.constant 0 : i32
    %c0_i32_0 = arith.constant 0 : i32
    %c0_i32_1 = arith.constant 0 : i32
    return %c0_i32, %c0_i32_0 : i32, i32
  }
  func.func @transform_3(%arg0: i32) -> (i32, i32) {
    %c0_i32 = arith.constant 0 : i32
    %c0_i32_0 = arith.constant 0 : i32
    %c0_i32_1 = arith.constant 0 : i32
    return %c0_i32, %c0_i32_0 : i32, i32
  }
  func.func @transform_4(%arg0: i32) -> (i32, i32) {
    %c0_i32 = arith.constant 0 : i32
    %c0_i32_0 = arith.constant 0 : i32
    return %arg0, %c0_i32 : i32, i32
  }
}

</mosaic_0001>

<bundles_post_ra>
// kernel: tpu_custom_call.1
= control target key start
LH: loop header
LB: loop body
LE: loop exit
PB: predicated region body
PF: predicated region fallthrough
CT: control target
= control target key end

     0   :  { %9 = vsyncpa [#allocation3], 0  ;;  %s1498_s0 = inlined_call_operand.vmem [shape: s32[32,8], index: 0, kind: input, shape index: {}]   ;;  %s1499_s1 = inlined_call_operand.vmem [shape: f32[8,528], index: 1, kind: input, shape index: {}]   ;;  %s1500_s2 = inlined_call_operand.hbm [shape: f32[1,528], index: 2, kind: input, shape index: {}]   ;;  %s1501_s3 = inlined_call_operand.hbm [shape: f32[528,128], index: 3, kind: input, shape index: {}]   ;;  %s1502_s4 = inlined_call_operand.hbm [shape: f32[32,128], index: 4, kind: output, shape index: {}]  }
   0x1   :  { %10 = vsyncpa [#allocation6], 0 }
   0x2   :  { %11 = vsyncpa [#allocation4], 0 }
   0x3   :  { %13 = vsyncpa [#allocation4 + $0x1], 0  ;;  %s1329_s15 = smov 0   ;;  %s1331_s16 = smov 0  }
   0x4   :  { %s1333_s17 = smov 0   ;;  %s1335_s18 = smov 0  }
   0x5 LB: > { %s1350_s19 = sadd.s32 4294967295, %s1293_s18   ;;  %s969_s20 = sadd.s32 4294967294, %s1293_s18   ;;  %s1293_s18 = sphi %s1335_s18, %s1520_s18   ;;  %s1289_s17 = sphi %s1333_s17, %s1519_s17   ;;  %s1285_s16 = sphi %s1331_s16, %s1518_s16   ;;  %s1281_s15 = sphi %s1329_s15, %s1517_s15  }
   0x6   : > { %s1354_s21 = sadd.s32 1, %s1293_s18   ;;  %s115_s22 = sadd.s32 1, %s1289_s17 }
   0x7   : > { %s112_s23 = ssub.s32 %s1293_s18, %s1354_s21  ;;  %p125_p0 = scmp.ne.s32.totalorder %s1289_s17, %s1285_s16 }
   0x8   : > { %p113_p1 = scmp.eq.s32.totalorder %s112_s23, 0  ;;  %p126_p2 = scmp.eq.s32.totalorder %s1350_s19, 1 }
   0x9   : > { %p131_p3 = scmp.ne.s32.totalorder %s1285_s16, %s1281_s15  ;;  %p132_p4 = scmp.eq.s32.totalorder %s969_s20, 1 }
   0xa   : > { %s1365_s24 = scalar_select %p113_p1, %s1289_s17, %s115_s22  }
   0xb   : > { %p1367_p5 = por %p126_p2, %p125_p0  ;;  %p1371_p6 = por %p132_p4, %p131_p3 }
   0xc   : > { %p970_p7 = scmp.ge.s32.totalorder %s1293_s18, 1  ;;  %p139_p8 = scmp.lt.s32.totalorder %s1293_s18, 3 }
   0xd   : > { %s1506_s25 = scalar_select %p1367_p5, 1, 0 }
   0xe   : > { %s1507_s26 = scalar_select %p1371_p6, 1, 0 }
   0xf   : > { %p1503_p9 = scmp.eq.s32.totalorder %s1350_s19, 0  ;;  %p1378_p10 = pnand %p970_p7, %p139_p8 }
  0x10   : > { %s1295_s28 = smov [#allocation2]   ;;  %s1296_s30 = smov [#allocation5]  }
  0x11   : > { %s1508_s27 = scalar_select %p1378_p10, 1, 0 }
  0x12   : > { %s155_s29 = sshll.u32 %s1295_s28, 4  ;;  %p1117_p11 = pneg %p1378_p10  ;;  %s156_s29 = int_to_ptr.vmem [resolvable:$true] %s155_s29 }
  0x13   : > { %s165_s5 = sshll.u32 %s1296_s30, 4  ;;  %s1184_s7 = scalar_lea.vmem %s156_s29, 80  ;;  %s166_s5 = int_to_ptr.vmem [resolvable:$true] %s165_s5 }
  0x14   : > { %p1386_p12 = pnand %p1503_p9, %p1117_p11  ;;  %p1185_p0 = scmp.ne.s32.totalorder %s156_s29, %s1184_s7 }
  0x15   : > { %s1191_s8 = scalar_lea.vmem %s156_s29, 96  ;;  %p1192_p3 = scmp.lt.s32.totalorder %s156_s29, %s156_s29 }
  0x16   : > { %p1175_p13 = pneg %p1386_p12  ;;  %p1193_p4 = scmp.lt.s32.totalorder %s1191_s8, %s1184_s7 }
  0x18   : > { %p1187_p1 = pnand %p1185_p0, %p1175_p13  ;;  %p1194_p7 = por %p1193_p4, %p1192_p3 }
  0x1a   : > { %p1188_p2 = pneg %p1187_p1 }
  0x1c   : > { %p1195_p8 = pnand %p1194_p7, %p1188_p2 }
  0x1e   : > { %1198 = shalt.err (!%p1195_p8)
}
  0x1f   : > { %1120 = dma.hbm_to_vmem [thread:$0]  (!%p1386_p12), %s1500_s2, 80, %s156_s29, [#allocation3]  }
  0x20   : > { %s1210_s11 = scalar_lea.vmem %s166_s5, 8448  ;;  %p1218_p1 = scmp.lt.s32.totalorder %s166_s5, %s166_s5 }
  0x21   : > { %p1211_p11 = scmp.ne.s32.totalorder %s166_s5, %s1210_s11  ;;  %p1219_p6 = scmp.lt.s32.totalorder %s1210_s11, %s1210_s11 }
  0x23   : > { %p1213_p9 = pnand %p1211_p11, %p1175_p13  ;;  %p1220_p5 = por %p1219_p6, %p1218_p1 }
  0x25   : > { %p1214_p0 = pneg %p1213_p9 }
  0x27   : > { %p1221_p10 = pnand %p1220_p5, %p1214_p0 }
  0x29   : > { %1224 = shalt.err (!%p1221_p10)
}
  0x2a   : > { %s1297_s12 = smov 128   ;;  %s1298_s13 = smov 8  }
  0x2b   : > { %1123 = dma.hbm_to_vmem [thread:$0]  (!%p1386_p12), %s1501_s3, 8448, %s166_s5, [#allocation6], %s1297_s12, %s1297_s12, %s1298_s13  }
  0x2c   : > { %p1510_p2 = scmp.ne.s32.totalorder %s1508_s27, 0 }
  0x2d   : > { %p1511_p3 = scmp.eq.s32.totalorder (!%p1510_p2), %s1350_s19, 0 }
  0x2e   : > { %190 = sbr.rel (%p1510_p2) target bundleno = 497 (0x1f1), region = 36 }
  0x33   : > { %1268 = dma.done.wait (%p1511_p3), [#allocation3], 80   ;;  %p1512_p9 = pmov %p1511_p3 }
  0x34   : > { %p1513_p5 = pmov %p1511_p3 }
  0x35   : > { %1270 = vsyncadd (%p1512_p9), [#allocation3], 4294967216 }
  0x36   : > { %1272 = dma.done.wait (%p1513_p5), [#allocation6], 8448   ;;  %p1514_p6 = pmov %p1511_p3 }
  0x37   : > { %s978_s22 = sshll.u32 %s1350_s19, 1  ;;  %v1299_v0 = vmov 0.0   ;;  %v254_v1 = vld [vmem:[%s1499_s1 + $0x8] sm:$0xff]  ;;  %v253_v2 = vld [vmem:[%s1499_s1] sm:$0xff]  ;;  %v256_v3 = vld [vmem:[%s1499_s1 + $0x18] sm:$0xff]  ;;  %vm258_vm4 = vcmask 64512  }
  0x38   : > { %1274 = vsyncadd (%p1514_p6), [#allocation6], 4294958848  ;;  %329 = vmatprep.mubr.f32.mxu0 %v1299_v0  ;;  %406 = vmatprep.mubr.f32.mxu1 %v1299_v0  ;;  %p221_p10 = scmp.lt.s32.totalorder %s978_s22, 3  ;;  %v255_v4 = vld [vmem:[%s1499_s1 + $0x10] sm:$0xff]  ;;  %v257_v5 = vld [vmem:[%s1499_s1 + $0x20] sm:$0xff]  ;;  %vm637_vm14 = vcmask 130048  }
  0x39   : > { %295 = vmatprep.subr.mxu0 %v254_v1  ;;  %372 = vmatprep.subr.mxu1 %v256_v3  ;;  %v602_v10 = vld [vmem:[#allocation5 + $0xf8] sm:$0xff]  ;;  %v601_v31 = vld [vmem:[#allocation5 + $0xf0] sm:$0xff]  ;;  %v600_v33 = vld [vmem:[#allocation5 + $0xe8] sm:$0xff]  ;;  %s217_s14 = sand.u32 1, %s1285_s16   ;;  %s1011_s27 = sshll.u32 %s1350_s19, 8 }
  0x3a   : > { %s1522_s22 = smov (!%p221_p10, %s978_s22), 3  ;;  %296 = vmatpush1.msra.mxu0 %v253_v2  ;;  %373 = vmatpush1.msra.mxu1 %v255_v4  ;;  %v634_v28 = vld [vmem:[#allocation5 + $0x1f8] sm:$0xff]  ;;  %v585_v32 = vld [vmem:[#allocation5 + $0x70] sm:$0xff]  ;;  %v584_v34 = vld [vmem:[#allocation5 + $0x68] sm:$0xff]  ;;  %s977_s20 = sshll.u32 %s217_s14, 4 }
  0x3b   : > { %s979_s23 = sshll.u32 %s1522_s22, 3  ;;  %1095 = vmatprep.subr.mxu0 %v257_v5  ;;  %1015 = vmatprep.subr.mxu1 %v602_v10  ;;  %v586_v30 = vld [vmem:[#allocation5 + $0x78] sm:$0xff]  ;;  %v599_v36 = vld [vmem:[#allocation5 + $0xe0] sm:$0xff]  ;;  %v633_v37 = vld [vmem:[#allocation5 + $0x1f0] sm:$0xff]  ;;  %s219_s22 = scalar_lea.vmem [#allocation7], %s977_s20 }
  0x3c   : > { %s224_s29 = scalar_lea.vmem %s1498_s0, %s979_s23  ;;  %v618_v35 = vld [vmem:[#allocation5 + $0x178] sm:$0xff]  ;;  %v583_v38 = vld [vmem:[#allocation5 + $0x60] sm:$0xff]  ;;  %v617_v39 = vld [vmem:[#allocation5 + $0x170] sm:$0xff]  ;;  %s885_s23 = sshll.u32 %s219_s22, 4  ;;  %s1451_s23 = int_to_ptr.vmem [resolvable:$true] %s885_s23 }
  0x3d   : > { %v227_v6 = vld [vmem:[%s224_s29] sm:$0xff]  ;;  %v228_v9 = vld [vmem:[%s224_s29 + $0x8] sm:$0xff]  ;;  %v597_v44 = vld [vmem:[#allocation5 + $0xd0] sm:$0xff]  ;;  %s1456_s30 = scalar_lea.hbm %s1502_s4, %s1011_s27  ;;  %s1458_s5 = scalar_lea.sflag [#allocation4], %s217_s14 }
  0x3e   : > { %v229_v7 = vand.u32 1, %v227_v6  ;;  %v231_v8 = vshra.s32 %v227_v6, 1  ;;  %v230_v11 = vand.u32 1, %v228_v9  ;;  %v232_v12 = vshra.s32 %v228_v9, 1  ;;  %v598_v40 = vld [vmem:[#allocation5 + $0xd8] sm:$0xff]  ;;  %v632_v41 = vld [vmem:[#allocation5 + $0x1e8] sm:$0xff] }
  0x3f   : > { %v582_v42 = vld [vmem:[#allocation5 + $0x58] sm:$0xff]  ;;  %v616_v43 = vld [vmem:[#allocation5 + $0x168] sm:$0xff]  ;;  %v631_v45 = vld [vmem:[#allocation5 + $0x1e0] sm:$0xff]  ;;  %s1225_s19 = scalar_lea.vmem %s1451_s23, 256  ;;  %p1515_p13 = scmp.ne.s32.totalorder %s1506_s25, 0 }
  0x40   : > { %v233_v13 = vadd.s32 32, %v231_v8  ;;  %v245_v14 = vsub.s32 1, %v229_v7  ;;  %v234_v15 = vadd.s32 32, %v232_v12  ;;  %v246_v16 = vsub.s32 1, %v230_v11  ;;  %v581_v46 = vld [vmem:[#allocation5 + $0x50] sm:$0xff]  ;;  %v615_v47 = vld [vmem:[#allocation5 + $0x160] sm:$0xff]  ;;  %p1226_p12 = scmp.ne.s32.totalorder %s1451_s23, %s1225_s19 }
  0x41   : > { %v596_v48 = vld [vmem:[#allocation5 + $0xc8] sm:$0xff]  ;;  %v630_v49 = vld [vmem:[#allocation5 + $0x1d8] sm:$0xff]  ;;  %v595_v52 = vld [vmem:[#allocation5 + $0xc0] sm:$0xff]  ;;  %s1301_s6 = smov [#allocation7]  }
  0x42   : > { %vm235_vm0 = vcmp.gt.s32.totalorder %v233_v13, 0  ;;  %vm237_vm1 = vcmp.gt.s32.totalorder %v234_v15, 0  ;;  %v247_v18 = vmul.u32 65, %v245_v14  ;;  %v248_v21 = vmul.u32 65, %v246_v16  ;;  %v580_v50 = vld [vmem:[#allocation5 + $0x48] sm:$0xff]  ;;  %v614_v51 = vld [vmem:[#allocation5 + $0x158] sm:$0xff]  ;;  %p1227_p4 = pnand %p1226_p12, %p1515_p13 }
  0x43   : > { %v236_v17 = vsel %vm235_vm0, %v233_v13, 0  ;;  %v238_v19 = vsel %vm237_vm1, %v234_v15, 0  ;;  %v629_v53 = vld [vmem:[#allocation5 + $0x1d0] sm:$0xff]  ;;  %v579_v54 = vld [vmem:[#allocation5 + $0x40] sm:$0xff]  ;;  %v594_v56 = vld [vmem:[#allocation5 + $0xb8] sm:$0xff]  ;;  %s1229_s7 = sshll.u32 %s1301_s6, 4  ;;  %s1230_s7 = int_to_ptr.vmem [resolvable:$false] %s1229_s7 }
  0x44   : > { %vm239_vm2 = vcmp.lt.s32.totalorder %v236_v17, 64  ;;  %vm241_vm3 = vcmp.lt.s32.totalorder %v238_v19, 64  ;;  %v613_v55 = vld [vmem:[#allocation5 + $0x150] sm:$0xff]  ;;  %v628_v57 = vld [vmem:[#allocation5 + $0x1c8] sm:$0xff]  ;;  %v578_v58 = vld [vmem:[#allocation5 + $0x38] sm:$0xff]  ;;  %p1228_p7 = pneg %p1227_p4  ;;  %s1231_s8 = scalar_lea.vmem %s1230_s7, 512 }
  0x45   : > { %v240_v20 = vsel %vm239_vm2, %v236_v17, 64  ;;  %v242_v23 = vsel %vm241_vm3, %v238_v19, 64  ;;  %v612_v59 = vld [vmem:[#allocation5 + $0x148] sm:$0xff]  ;;  %v593_v60 = vld [vmem:[#allocation5 + $0xb0] sm:$0xff]  ;;  %v627_v61 = vld [vmem:[#allocation5 + $0x1c0] sm:$0xff]  ;;  %p1232_p8 = scmp.lt.s32.totalorder %s1451_s23, %s1230_s7  ;;  %p1233_p11 = scmp.lt.s32.totalorder %s1231_s8, %s1225_s19 }
  0x46   : > { %v243_v22 = vmul.u32 %v240_v20, %v229_v7  ;;  %v244_v24 = vmul.u32 %v242_v23, %v230_v11  ;;  %v577_v62 = vld [vmem:[#allocation5 + $0x30] sm:$0xff]  ;;  %v611_v63 = vld [vmem:[#allocation5 + $0x140] sm:$0xff]  ;;  %v592_v1 = vld [vmem:[#allocation5 + $0xa8] sm:$0xff] }
  0x47   : > { %v626_v2 = vld [vmem:[#allocation5 + $0x1b8] sm:$0xff]  ;;  %v576_v3 = vld [vmem:[#allocation5 + $0x28] sm:$0xff]  ;;  %v625_v6 = vld [vmem:[#allocation5 + $0x1b0] sm:$0xff]  ;;  %p1234_p0 = por %p1233_p11, %p1232_p8 }
  0x48   : > { %v249_v25 = vadd.s32 %v247_v18, %v243_v22  ;;  %v250_v26 = vadd.s32 %v248_v21, %v244_v24  ;;  %v610_v4 = vld [vmem:[#allocation5 + $0x138] sm:$0xff]  ;;  %v609_v7 = vld [vmem:[#allocation5 + $0x130] sm:$0xff]  ;;  %v624_v8 = vld [vmem:[#allocation5 + $0x1a8] sm:$0xff] }
  0x49   : > { %v608_v9 = vld [vmem:[#allocation5 + $0x128] sm:$0xff]  ;;  %v623_v10 = vld [vmem:[#allocation5 + $0x1a0] sm:$0xff]  ;;  %v590_v13 = vld [vmem:[#allocation5 + $0x98] sm:$0xff]  ;;  %p1235_p1 = pnand %p1234_p0, %p1228_p7 }
  0x4a   : > { %v251_v27 = vcvt.s32.f32 %v249_v25  ;;  %v252_v29 = vcvt.s32.f32 %v250_v26  ;;  %v575_v11 = vld [vmem:[#allocation5 + $0x20] sm:$0xff]  ;;  %v622_v14 = vld [vmem:[#allocation5 + $0x198] sm:$0xff]  ;;  %v589_v17 = vld [vmem:[#allocation5 + $0x90] sm:$0xff] }
  0x4b   : > { %v607_v12 = vld [vmem:[#allocation5 + $0x120] sm:$0xff]  ;;  %v574_v15 = vld [vmem:[#allocation5 + $0x18] sm:$0xff]  ;;  %v621_v18 = vld [vmem:[#allocation5 + $0x190] sm:$0xff] }
  0x4c   : > { %980 = vmatmul.mubr.msk.f32.vlgmr.msra.gmra.mxu0 %vm258_vm4, %v251_v27  ;;  %982 = vmatmul.mubr.msk.f32.vlgmr.msra.gmra.mxu1 %vm258_vm4, %v251_v27  ;;  %v606_v16 = vld [vmem:[#allocation5 + $0x118] sm:$0xff]  ;;  %v573_v19 = vld [vmem:[#allocation5 + $0x10] sm:$0xff]  ;;  %v588_v21 = vld [vmem:[#allocation5 + $0x88] sm:$0xff] }
  0x4d   : > { %1096 = vmatpush3.msra.mxu0 %v257_v5  ;;  %335 = vmatprep.mubr.f32.mxu0 %v1299_v0  ;;  %v591_v5 = vld [vmem:[#allocation5 + $0xa0] sm:$0xff]  ;;  %v605_v20 = vld [vmem:[#allocation5 + $0x110] sm:$0xff]  ;;  %v620_v22 = vld [vmem:[#allocation5 + $0x188] sm:$0xff] }
  0x4e   : > { %412 = vmatprep.mubr.f32.mxu1 %v1299_v0  ;;  %1053 = vmatprep.subr.mxu0 %v634_v28  ;;  %v572_v23 = vld [vmem:[#allocation5 + $0x8] sm:$0xff]  ;;  %v587_v25 = vld [vmem:[#allocation5 + $0x80] sm:$0xff] }
  0x4f   : > { %1016 = vmatpush3.msra.mxu1 %v586_v30  ;;  %v604_v24 = vld [vmem:[#allocation5 + $0x108] sm:$0xff]  ;;  %v619_v26 = vld [vmem:[#allocation5 + $0x180] sm:$0xff]  ;;  %v496_v30 = vlaneseq }
  0x50   : > { %981 = vmatmul.mubr.msk.f32.gmra.mxu0 %vm258_vm4, %v252_v29  ;;  %983 = vmatmul.mubr.msk.f32.gmra.mxu1 %vm258_vm4, %v252_v29  ;;  %v603_v28 = vld [vmem:[#allocation5 + $0x100] sm:$0xff] }
  0x51   : > { %1097 = vmatprep.mubr.msk.f32.mxu0 %vm258_vm4, %v251_v27  ;;  %1017 = vmatprep.subr.mxu1 %v601_v31  ;;  %v571_v27 = vld [vmem:[#allocation5] sm:$0xff]  ;;  %v497_v31 = vshrl.u32 %v496_v30, 7 }
  0x52   : > { %1018 = vmatpush3.msra.mxu1 %v585_v32 }
  0x53   : > { %1019 = vmatprep.subr.mxu1 %v600_v33  ;;  %v498_v32 = vsub.s32 0, %v497_v31  ;;  %v506_v33 = vsub.s32 2, %v497_v31 }
  0x54   : > { %1098 = vmatmul.mubr.msk.f32.vlgmr.msra.gmra.mxu0 %vm258_vm4, %v252_v29  ;;  %1020 = vmatpush3.msra.mxu1 %v584_v34  ;;  %v636_v29 = vld [vmem:[#allocation5 + $0x208] sm:$0xff]  ;;  %v494_v34 = vld [vmem:[#allocation2] sm:$0x1f] }
  0x55   : > { %1054 = vmatpush3.msra.mxu0 %v618_v35  ;;  %1021 = vmatprep.subr.mxu1 %v599_v36  ;;  %v502_v35 = vsub.s32 1, %v497_v31  ;;  %v510_v36 = vsub.s32 3, %v497_v31 }
  0x56   : > { %1055 = vmatprep.subr.mxu0 %v633_v37  ;;  %1022 = vmatpush3.msra.mxu1 %v583_v38  ;;  %v499_v37 = vrot.slane %v494_v34, %v498_v32  ;;  %v507_v38 = vrot.slane %v494_v34, %v506_v33 }
  0x57   : > { %1056 = vmatpush3.msra.mxu0 %v617_v39  ;;  %1023 = vmatprep.subr.mxu1 %v598_v40  ;;  %v503_v39 = vrot.slane %v494_v34, %v502_v35  ;;  %v511_v40 = vrot.slane %v494_v34, %v510_v36 }
  0x58   : > { %1057 = vmatprep.subr.mxu0 %v632_v41  ;;  %1024 = vmatpush3.msra.mxu1 %v582_v42 }
  0x59   : > { %1058 = vmatpush3.msra.mxu0 %v616_v43  ;;  %1025 = vmatprep.subr.mxu1 %v597_v44 }
  0x5a   : > { %1059 = vmatprep.subr.mxu0 %v631_v45  ;;  %1026 = vmatpush3.msra.mxu1 %v581_v46  ;;  %v514_v45 = vsub.s32 4, %v497_v31 }
  0x5b   : > { %1060 = vmatpush3.msra.mxu0 %v615_v47  ;;  %1027 = vmatprep.subr.mxu1 %v596_v48 }
  0x5c   : > { %1061 = vmatprep.subr.mxu0 %v630_v49  ;;  %1028 = vmatpush3.msra.mxu1 %v580_v50 }
  0x5d   : > { %1062 = vmatpush3.msra.mxu0 %v614_v51  ;;  %1029 = vmatprep.subr.mxu1 %v595_v52 }
  0x5e   : > { %1063 = vmatprep.subr.mxu0 %v629_v53  ;;  %1030 = vmatpush3.msra.mxu1 %v579_v54 }
  0x5f   : > { %1064 = vmatpush3.msra.mxu0 %v613_v55  ;;  %1031 = vmatprep.subr.mxu1 %v594_v56  ;;  %v515_v56 = vrot.slane %v494_v34, %v514_v45 }
  0x60   : > { %1065 = vmatprep.subr.mxu0 %v628_v57  ;;  %1032 = vmatpush3.msra.mxu1 %v578_v58 }
  0x61   : > { %1066 = vmatpush3.msra.mxu0 %v612_v59  ;;  %1033 = vmatprep.subr.mxu1 %v593_v60 }
  0x62   : > { %1067 = vmatprep.subr.mxu0 %v627_v61  ;;  %1034 = vmatpush3.msra.mxu1 %v577_v62 }
  0x63   : > { %1068 = vmatpush3.msra.mxu0 %v611_v63  ;;  %1035 = vmatprep.subr.mxu1 %v592_v1  ;;  %v635_v63 = vld [vmem:[#allocation5 + $0x200] sm:$0xff] }
  0x64   : > { %1069 = vmatprep.subr.mxu0 %v626_v2  ;;  %1036 = vmatpush3.msra.mxu1 %v576_v3 }
  0x65   : > { %1070 = vmatpush3.msra.mxu0 %v610_v4  ;;  %1037 = vmatprep.subr.mxu1 %v591_v5  ;;  %v1300_v4 = vmov 1.0  }
  0x66   : > { %1071 = vmatprep.subr.mxu0 %v625_v6  ;;  %1038 = vmatpush3.msra.mxu1 %v575_v11 }
  0x67   : > { %1072 = vmatpush3.msra.mxu0 %v609_v7  ;;  %1039 = vmatprep.subr.mxu1 %v590_v13 }
  0x68   : > { %1073 = vmatprep.subr.mxu0 %v624_v8  ;;  %1040 = vmatpush3.msra.mxu1 %v574_v15 }
  0x69   : > { %1074 = vmatpush3.msra.mxu0 %v608_v9  ;;  %1041 = vmatprep.subr.mxu1 %v589_v17 }
  0x6a   : > { %1075 = vmatprep.subr.mxu0 %v623_v10  ;;  %1042 = vmatpush3.msra.mxu1 %v573_v19 }
  0x6b   : > { %1076 = vmatpush3.msra.mxu0 %v607_v12  ;;  %1043 = vmatprep.subr.mxu1 %v588_v21 }
  0x6c   : > { %1077 = vmatprep.subr.mxu0 %v622_v14  ;;  %1044 = vmatpush3.msra.mxu1 %v572_v23 }
  0x6d   : > { %1078 = vmatpush3.msra.mxu0 %v606_v16  ;;  %1045 = vmatprep.subr.mxu1 %v587_v25 }
  0x6e   : > { %1079 = vmatprep.subr.mxu0 %v621_v18  ;;  %1046 = vmatpush3.msra.mxu1 %v571_v27 }
  0x6f   : > { %1080 = vmatpush3.msra.mxu0 %v605_v20  ;;  %1100 = vmatprep.subr.mxu1 %v636_v29 }
  0x70   : > { %1081 = vmatprep.subr.mxu0 %v620_v22 }
  0x71   : > { %1082 = vmatpush3.msra.mxu0 %v604_v24 }
  0x72   : > { %1083 = vmatprep.subr.mxu0 %v619_v26 }
  0x73   : > { %1084 = vmatpush3.msra.mxu0 %v603_v28 }
 0x10c   : > { %v331_v41 = vpop.f32.mrf.mxu0  ;;  %v408_v42 = vpop.f32.mrf.mxu1 }
 0x10d   : > { %v521_v43 = vsub.f32 %v331_v41, %v499_v37  ;;  %v523_v44 = vsub.f32 %v408_v42, %v507_v38 }
 0x10e   : > { %v333_v46 = vpop.f32.mrf.mxu0  ;;  %v410_v47 = vpop.f32.mrf.mxu1 }
 0x10f   : > { %v522_v48 = vsub.f32 %v333_v46, %v503_v39  ;;  %v524_v49 = vsub.f32 %v410_v47, %v511_v40  ;;  %v531_v50 = vand.u32 2147483647, %v521_v43  ;;  %v533_v51 = vand.u32 2147483647, %v523_v44 }
 0x110   : > { %v337_v52 = vpop.f32.mrf.mxu0  ;;  %v414_v53 = vpop.f32.mrf.mxu1 }
 0x111   : > { %v532_v54 = vand.u32 2147483647, %v522_v48  ;;  %v534_v55 = vand.u32 2147483647, %v524_v49  ;;  %v526_v57 = vsub.f32 %v337_v52, %v499_v37  ;;  %v528_v58 = vsub.f32 %v414_v53, %v507_v38 }
 0x112   : > { %v339_v59 = vpop.f32.mrf.mxu0  ;;  %v416_v60 = vpop.f32.mrf.mxu1  ;;  %vm541_vm7 = vcmp.lt.f32.partialorder %v531_v50, 0.5  ;;  %vm543_vm8 = vcmp.lt.f32.partialorder %v533_v51, 0.5 }
 0x113   : > { %vm542_vm5 = vcmp.lt.f32.partialorder %v532_v54, 0.5  ;;  %vm544_vm6 = vcmp.lt.f32.partialorder %v534_v55, 0.5  ;;  %v527_v61 = vsub.f32 %v339_v59, %v503_v39  ;;  %v529_v62 = vsub.f32 %v416_v60, %v511_v40 }
 0x114   : > { %v536_v1 = vand.u32 2147483647, %v526_v57  ;;  %v538_v2 = vand.u32 2147483647, %v528_v58  ;;  %v1099_v3 = vpop.f32.mrf.mxu0  ;;  %996 = vmatprep.mubr.msk.f32.mxu1 %vm542_vm5, %v1300_v4  ;;  %1000 = vmatprep.mubr.msk.f32.mxu0 %vm544_vm6, %v1300_v4 }
 0x115   : > { %v537_v5 = vand.u32 2147483647, %v527_v61  ;;  %v539_v6 = vand.u32 2147483647, %v529_v62  ;;  %v530_v7 = vsub.f32 %v1099_v3, %v515_v56  ;;  %997 = vmatmul.mubr.msk.f32.vlgmr.msra.gmra.mxu1 %vm541_vm7, %v1300_v4  ;;  %1001 = vmatmul.mubr.msk.f32.vlgmr.msra.gmra.mxu0 %vm543_vm8, %v1300_v4 }
 0x116   : > { %v485_v8 = vpop.f32.mrf.mxu0  ;;  %1101 = vmatpush3.msra.mxu1 %v636_v29  ;;  %vm546_vm11 = vcmp.lt.f32.partialorder %v536_v1, 0.5  ;;  %vm548_vm12 = vcmp.lt.f32.partialorder %v538_v2, 0.5 }
 0x117   : > { %vm547_vm9 = vcmp.lt.f32.partialorder %v537_v5, 0.5  ;;  %vm549_vm10 = vcmp.lt.f32.partialorder %v539_v6, 0.5  ;;  %v540_v9 = vand.u32 2147483647, %v530_v7  ;;  %v525_v10 = vsub.f32 %v485_v8, %v515_v56  ;;  %1102 = vmatprep.subr.mxu1 %v635_v63 }
 0x118   : > { %998 = vmatprep.mubr.msk.f32.mxu1 %vm547_vm9, %v1300_v4  ;;  %1002 = vmatprep.mubr.msk.f32.mxu0 %vm549_vm10, %v1300_v4 }
 0x119   : > { %v535_v11 = vand.u32 2147483647, %v525_v10  ;;  %999 = vmatmul.mubr.msk.f32.gmra.mxu1 %vm546_vm11, %v1300_v4  ;;  %1003 = vmatmul.mubr.msk.f32.gmra.mxu0 %vm548_vm12, %v1300_v4  ;;  %vm550_vm13 = vcmp.lt.f32.partialorder %v540_v9, 0.5 }
 0x11a   : > { %1103 = vmatpush3.msra.mxu1 %v635_v63  ;;  %v995_v13 = vsel %vm550_vm13, 1.0, %v1299_v0 }
 0x11b   : > { %vm545_vm15 = vcmp.lt.f32.partialorder %v535_v11, 0.5 }
 0x11c   : > { %v990_v12 = vsel %vm545_vm15, 1.0, %v1299_v0 }
 0x11d   : > { %1104 = vmatprep.mubr.msk.f32.mxu1 %vm637_vm14, %v990_v12 }
 0x11e   : > { %1105 = vmatmul.mubr.msk.f32.vlgmr.msra.gmra.mxu1 %vm637_vm14, %v995_v13 }
 0x1d5   : > { %v1047_v14 = vpop.f32.mrf.mxu1  ;;  %v1085_v15 = vpop.f32.mrf.mxu0 }
 0x1d7   : > { %v1048_v16 = vpop.f32.mrf.mxu1  ;;  %v1086_v17 = vpop.f32.mrf.mxu0 }
 0x1d8   : > { %v1049_v20 = vadd.f32 %v1048_v16, %v1047_v14  ;;  %v1087_v21 = vadd.f32 %v1086_v17, %v1085_v15 }
 0x1d9   : > { %v1050_v18 = vpop.f32.mrf.mxu1  ;;  %v1088_v19 = vpop.f32.mrf.mxu0 }
 0x1da   : > { %v786_v27 = vadd.f32 %v1087_v21, %v1049_v20 }
 0x1db   : > { %v1051_v22 = vpop.f32.mrf.mxu1  ;;  %v1089_v23 = vpop.f32.mrf.mxu0 }
 0x1dc   : > { %v1052_v24 = vadd.f32 %v1051_v22, %v1050_v18  ;;  %v1090_v25 = vadd.f32 %v1089_v23, %v1088_v19 }
 0x1de   : > { %v791_v0 = vadd.f32 %v1090_v25, %v1052_v24  ;;  %v1106_v26 = vpop.f32.mrf.mxu1 }
 0x1e0   : > { %v866_v28 = vadd.f32 %v1106_v26, %v791_v0  ;;  %v860_v29 = vpop.f32.mrf.mxu1 }
 0x1e1   : > { %v861_v30 = vadd.f32 %v860_v29, %v786_v27 }
 0x1e2   : > { %870 = vst [vmem:[%s219_s22 + $0x8] sm:$0xff] %v866_v28 }
 0x1e3   : > { %869 = vst [vmem:[%s219_s22] sm:$0xff] %v861_v30 }
 0x1e4   : > { %1238 = shalt.err (!%p1235_p1)
}
 0x1e5   : > { %s1239_s9 = scalar_lea.hbm %s1456_s30, 256  ;;  %s1243_s12 = scalar_lea.hbm %s1502_s4, 512 }
 0x1e6   : > { %p1240_p2 = scmp.ne.s32.totalorder %s1456_s30, %s1239_s9  ;;  %p1244_p5 = scmp.lt.s32.totalorder %s1456_s30, %s1502_s4 }
 0x1e7   : > { %p1245_p6 = scmp.lt.s32.totalorder %s1243_s12, %s1239_s9 }
 0x1e8   : > { %p1241_p3 = pnand %p1240_p2, %p1515_p13 }
 0x1e9   : > { %p1246_p10 = por %p1245_p6, %p1244_p5 }
 0x1ea   : > { %p1242_p9 = pneg %p1241_p3 }
 0x1ec   : > { %p1247_p12 = pnand %p1246_p10, %p1242_p9 }
 0x1ee   : > { %1250 = shalt.err (!%p1247_p12)
}
 0x1ef   : > { %s1302_s20 = smov 128   ;;  %s1303_s22 = smov 8  }
 0x1f0   : > { %1115 = dma.vmem_to_hbm [thread:$0]  (%p1515_p13), %s1451_s23, 256, %s1456_s30, %s1458_s5, %s1302_s20, %s1302_s20, %s1303_s22  }
 0x1f1 PF: > { %p1132_p4 = scmp.ge.s32.totalorder %s1293_s18, 2  ;;  %s900_s27 = sand.u32 1, %s1281_s15  }
 0x1f2   : > { %p1516_p7 = scmp.ne.s32.totalorder %s1507_s26, 0  ;;  %s901_s28 = scalar_lea.sflag [#allocation4], %s900_s27 }
 0x1f4   : > { %p1125_p8 = pnand %p1132_p4, %p1516_p7 }
 0x1f6   : > { %p1126_p11 = pneg %p1125_p8 }
 0x1f8   : > { %1276 = dma.done.wait (%p1126_p11), %s901_s28, 256  }
 0x1f9   : > { %1278 = vsyncadd (%p1126_p11), %s901_s28, 4294967040  ;;  %p16_p0 = scmp.ge.s32.totalorder %s1354_s21, 4   ;;  %s1517_s15 = smov %s1285_s16 }
 0x1fa   : > { %s1518_s16 = smov %s1289_s17  ;;  %s1519_s17 = smov %s1365_s24 }
 0x1fb   : > { %s1520_s18 = smov %s1354_s21  ;;  %18 = sbr.rel (!%p16_p0) target bundleno = 5 (0x5), region = 80 }
 0x200   :  { %906 = vsyncpa [#allocation3], 1 }
 0x201   :  { %908 = vsyncpa [#allocation3 + $0x1], 1 }
 0x202   :  { %909 = vsyncpa [#allocation6], 1 }
 0x203   :  { %910 = vsyncpa [#allocation4], 1 }
 0x204   :  { %912 = vsyncpa [#allocation4 + $0x1], 1 }

</bundles_post_ra>
